<compile_context>
chip_gen: v7x
topology: tpu7x:2x2x1
jax: 0.10.0
libtpu: 0.0.40
codegen_flags: <defaults>
</compile_context>

<pallas_src>
import functools
import math

import jax
import jax.numpy as jnp
from jax.experimental import pallas as pl
from jax.experimental.pallas import tpu as pltpu


def _log_l1_kernel(p_ref, q_ref, o_ref, *, eps):
    # Block is (tile_rows, D) with the full last dim, so the per-row min is
    # exact within a block. Overhang rows of the last block may hold garbage
    # (reads are padded); any NaN from log(garbage) stays in those rows and is
    # dropped by the masked store.
    p = p_ref[...].astype(jnp.float32)
    q = q_ref[...].astype(jnp.float32)
    minp = jnp.min(p, axis=-1, keepdims=True)
    minq = jnp.min(q, axis=-1, keepdims=True)
    lp = jnp.log((p - minp) + eps)
    lq = jnp.log((q - minq) + eps)
    o_ref[...] = jnp.abs(lp - lq).astype(o_ref.dtype)


def _generation_budget():
    """Returns (default per-array block bytes, vmem_limit cap) per TPU gen."""
    try:
        phys_vmem = int(pltpu.get_tpu_info().vmem_capacity_bytes)
    except Exception:
        phys_vmem = 128 << 20  # conservative default (v5e/v6e)
    if phys_vmem <= (64 << 20):
        # v7x: 64 MiB / TensorCore -> smaller blocks, keep 2-deep pipelining.
        return 4 << 20, 48 << 20
    # v5e / v6e: 128 MiB physical VMEM -> bigger blocks, raise scoped limit.
    return 6 << 20, 96 << 20


def _choose_tile_rows(R, pack, budget_rows):
    """Largest row tile (multiple of `pack`) within the VMEM budget, with at
    least 2 grid steps (best-effort even count) so v7x megacore engages."""
    budget_rows = max(pack, (budget_rows // pack) * pack)
    if R <= pack:
        return R  # block rows == full array dim: always legal, cannot split
    steps = max(2, pl.cdiv(R, budget_rows))
    if steps % 2:
        steps += 1  # prefer an even step count (2-TC balance on v7x)
    tile = pl.cdiv(pl.cdiv(R, steps), pack) * pack
    return max(pack, min(tile, budget_rows))


def log_l1_loss(p: jax.Array, q: jax.Array, eps: float = 1.0,
                *, target_block_bytes: int | None = None) -> jax.Array:
    """|log(p - min(p,-1) + eps) - log(q - min(q,-1) + eps)|, reduction='none'."""
    assert p.shape == q.shape, "p and q must have the same shape"
    orig_shape = p.shape
    out_dtype = jnp.result_type(p.dtype, q.dtype)

    D = orig_shape[-1]
    R = math.prod(orig_shape[:-1]) if len(orig_shape) > 1 else 1
    # Collapsing leading dims is a metadata-only reshape (no HBM copy).
    p2 = p.reshape(R, D)
    q2 = q.reshape(R, D)

    p_item = jnp.dtype(p.dtype).itemsize
    q_item = jnp.dtype(q.dtype).itemsize
    o_item = jnp.dtype(out_dtype).itemsize
    # Sublane packing of the narrowest dtype (8 for 32-bit, 16 bf16, 32 int8).
    pack = max(8, 32 // max(1, min(p_item, q_item, o_item)))

    default_block, vmem_cap = _generation_budget()
    if target_block_bytes is None:
        target_block_bytes = default_block

    # Dtype-aware budget: size the block for the widest of the three arrays.
    bytes_per_row = D * max(p_item, q_item, o_item)
    budget_rows = max(1, target_block_bytes // bytes_per_row)
    tile_rows = _choose_tile_rows(R, pack, budget_rows)

    grid = (pl.cdiv(R, tile_rows),)

    # Scoped-VMEM limit sized to the 2-deep pipelined footprint + headroom.
    # NOTE: if a single `pack`-row block already exceeds the cap (enormous D),
    # this still clamps; such shapes would need a streamed two-pass min.
    pipeline_bytes = 2 * tile_rows * D * (p_item + q_item + o_item)
    vmem_limit = int(min(vmem_cap, max(32 << 20, pipeline_bytes + (8 << 20))))

    kernel = functools.partial(_log_l1_kernel, eps=float(eps))

    out2d = pl.pallas_call(
        kernel,
        out_shape=jax.ShapeDtypeStruct((R, D), out_dtype),
        grid_spec=pltpu.PrefetchScalarGridSpec(
            num_scalar_prefetch=0,
            grid=grid,
            in_specs=[
                pl.BlockSpec((tile_rows, D), lambda i: (i, 0)),
                pl.BlockSpec((tile_rows, D), lambda i: (i, 0)),
            ],
            out_specs=pl.BlockSpec((tile_rows, D), lambda i: (i, 0)),
        ),
        compiler_params=pltpu.CompilerParams(
            dimension_semantics=("parallel",),
            vmem_limit_bytes=vmem_limit,
        ),
    )(p2, q2)

    return out2d.reshape(orig_shape)


def _reference(p, q, eps):
    p = p.astype(jnp.float32)
    q = q.astype(jnp.float32)
    minp = jnp.min(p, axis=-1, keepdims=True)
    minq = jnp.min(q, axis=-1, keepdims=True)
    return jnp.abs(jnp.log(p - minp + eps) - jnp.log(q - minq + eps))


if __name__ == "__main__":
    key = jax.random.PRNGKey(0)
    kp, kq, kp2, kq2, kp3, kq3 = jax.random.split(key, 6)
    eps = 1.0

    # Lane-dense f32 case: batch=2, channels=4, seq=16, features=128.
    shape = (2, 4, 16, 128)
    p = jax.random.normal(kp, shape, dtype=jnp.float32) * 3.0
    q = jax.random.normal(kq, shape, dtype=jnp.float32) * 3.0
    y = log_l1_loss(p, q, eps=eps)
    jax.block_until_ready(y)
    assert y.shape == p.shape
    assert jnp.allclose(y, _reference(p, q, eps), rtol=1e-5, atol=1e-5), \
        "mismatch vs reference (aligned f32 case)"

    # Ragged / non-128-aligned case; tiny block budget forces the multi-block
    # masked-overhang path (no jnp.pad, no trailing slice).
    shape2 = (3, 5, 7, 33)
    p2 = jax.random.normal(kp2, shape2, dtype=jnp.float32) * 2.0
    q2 = jax.random.normal(kq2, shape2, dtype=jnp.float32) * 2.0
    y2 = log_l1_loss(p2, q2, eps=eps, target_block_bytes=4096)
    jax.block_until_ready(y2)
    assert y2.shape == p2.shape
    assert jnp.allclose(y2, _reference(p2, q2, eps), rtol=1e-5, atol=1e-5), \
        "mismatch vs reference (ragged case)"

    # bf16 case: exercises dtype-aware tile budget and 16-row sublane packing.
    shape3 = (4, 8, 128)
    p3 = (jax.random.normal(kp3, shape3, dtype=jnp.float32) * 2.0).astype(jnp.bfloat16)
    q3 = (jax.random.normal(kq3, shape3, dtype=jnp.float32) * 2.0).astype(jnp.bfloat16)
    y3 = log_l1_loss(p3, q3, eps=eps)
    jax.block_until_ready(y3)
    assert y3.shape == p3.shape and y3.dtype == jnp.bfloat16
    ref3 = _reference(p3, q3, eps).astype(jnp.bfloat16).astype(jnp.float32)
    assert jnp.allclose(y3.astype(jnp.float32), ref3, rtol=2e-2, atol=2e-2), \
        "mismatch vs reference (bf16 case)"

    print("KERNEL_OK")
</pallas_src>

<mosaic_0001>
module attributes {stable_mosaic.version = 11 : i64} {
  func.func @_log_l1_kernel(%arg0: i32, %arg1: memref<64x128xf32, #tpu.memory_space<vmem>>, %arg2: memref<64x128xf32, #tpu.memory_space<vmem>>, %arg3: memref<64x128xf32, #tpu.memory_space<vmem>>) attributes {dimension_semantics = [#tpu.dimension_semantics<parallel>], iteration_bounds = array<i64: 2>, scalar_prefetch = 0 : i64, scratch_operands = 0 : i64, tpu.core_type = #tpu.core_type<tc>, window_params = [{transform_indices = @transform_0, window_bounds = array<i64: 64, 128>}, {transform_indices = @transform_1, window_bounds = array<i64: 64, 128>}, {transform_indices = @transform_2, window_bounds = array<i64: 64, 128>}]} {
    %c0 = arith.constant 0 : index
    %c0_0 = arith.constant 0 : index
    %0 = vector.load %arg1[%c0, %c0_0] : memref<64x128xf32, #tpu.memory_space<vmem>>, vector<64x128xf32>
    %c0_1 = arith.constant 0 : index
    %c0_2 = arith.constant 0 : index
    %1 = vector.load %arg2[%c0_1, %c0_2] : memref<64x128xf32, #tpu.memory_space<vmem>>, vector<64x128xf32>
    %cst = arith.constant dense<0x7F800000> : vector<64xf32>
    %2 = vector.multi_reduction <minimumf>, %0, %cst [1] : vector<64x128xf32> to vector<64xf32>
    %3 = vector.shape_cast %2 : vector<64xf32> to vector<64x1xf32>
    %cst_3 = arith.constant dense<0x7F800000> : vector<64xf32>
    %4 = vector.multi_reduction <minimumf>, %1, %cst_3 [1] : vector<64x128xf32> to vector<64xf32>
    %5 = vector.shape_cast %4 : vector<64xf32> to vector<64x1xf32>
    %6 = vector.broadcast %3 : vector<64x1xf32> to vector<64x128xf32>
    %7 = arith.subf %0, %6 : vector<64x128xf32>
    %cst_4 = arith.constant 1.000000e+00 : f32
    %8 = vector.broadcast %cst_4 : f32 to vector<64x128xf32>
    %9 = arith.addf %7, %8 : vector<64x128xf32>
    %10 = math.log %9 : vector<64x128xf32>
    %11 = vector.broadcast %5 : vector<64x1xf32> to vector<64x128xf32>
    %12 = arith.subf %1, %11 : vector<64x128xf32>
    %cst_5 = arith.constant 1.000000e+00 : f32
    %13 = vector.broadcast %cst_5 : f32 to vector<64x128xf32>
    %14 = arith.addf %12, %13 : vector<64x128xf32>
    %15 = math.log %14 : vector<64x128xf32>
    %16 = arith.subf %10, %15 : vector<64x128xf32>
    %17 = math.absf %16 : vector<64x128xf32>
    %c0_6 = arith.constant 0 : index
    %c0_7 = arith.constant 0 : index
    %18 = vector.load %arg3[%c0_6, %c0_7] : memref<64x128xf32, #tpu.memory_space<vmem>>, vector<64x128xf32>
    tpu.vector_store %arg3[%c0_6, %c0_7], %17 {strides = array<i32>} : memref<64x128xf32, #tpu.memory_space<vmem>>, vector<64x128xf32>,
    return
  }
  func.func @transform_0(%arg0: i32) -> (i32, i32) {
    %c0_i32 = arith.constant 0 : i32
    %c0_i32_0 = arith.constant 0 : i32
    return %arg0, %c0_i32 : i32, i32
  }
  func.func @transform_1(%arg0: i32) -> (i32, i32) {
    %c0_i32 = arith.constant 0 : i32
    %c0_i32_0 = arith.constant 0 : i32
    return %arg0, %c0_i32 : i32, i32
  }
  func.func @transform_2(%arg0: i32) -> (i32, i32) {
    %c0_i32 = arith.constant 0 : i32
    %c0_i32_0 = arith.constant 0 : i32
    return %arg0, %c0_i32 : i32, i32
  }
}

</mosaic_0001>

<bundles_post_ra>
// kernel: tpu_custom_call.1
= control target key start
LH: loop header
LB: loop body
LE: loop exit
PB: predicated region body
PF: predicated region fallthrough
CT: control target
= control target key end

     0   :  { %7 = vsyncpa [#allocation3], 0  ;;  %s978_s0 = inlined_call_operand.hbm [shape: f32[128,128], index: 0, kind: input, shape index: {}]   ;;  %s979_s1 = inlined_call_operand.hbm [shape: f32[128,128], index: 1, kind: input, shape index: {}]   ;;  %s980_s2 = inlined_call_operand.hbm [shape: f32[128,128], index: 2, kind: output, shape index: {}]  }
   0x1   :  { %9 = vsyncpa [#allocation3 + $0x1], 0 }
   0x2   :  { %10 = vsyncpa [#allocation6], 0 }
   0x3   :  { %12 = vsyncpa [#allocation6 + $0x1], 0 }
   0x4   :  { %13 = vsyncpa [#allocation4], 0 }
   0x5   :  { %15 = vsyncpa [#allocation4 + $0x1], 0  ;;  %s713_s9 = smov 0   ;;  %s715_s10 = smov 0  }
   0x6   :  { %s717_s11 = smov 0   ;;  %s719_s12 = smov 0  }
   0x7 LB: > { %s734_s13 = sadd.s32 4294967295, %s689_s12   ;;  %s451_s14 = sadd.s32 4294967294, %s689_s12   ;;  %s689_s12 = sphi %s719_s12, %s996_s12   ;;  %s685_s11 = sphi %s717_s11, %s995_s11   ;;  %s681_s10 = sphi %s715_s10, %s994_s10   ;;  %s677_s9 = sphi %s713_s9, %s993_s9  }
   0x8   : > { %s738_s15 = sadd.s32 1, %s689_s12   ;;  %s28_s16 = sadd.s32 1, %s685_s11 }
   0x9   : > { %s25_s17 = ssub.s32 %s689_s12, %s738_s15  ;;  %p35_p0 = scmp.ne.s32.totalorder %s685_s11, %s681_s10 }
   0xa   : > { %p26_p1 = scmp.eq.s32.totalorder %s25_s17, 0  ;;  %p36_p2 = scmp.eq.s32.totalorder %s689_s12, 0 }
   0xb   : > { %p41_p3 = scmp.ne.s32.totalorder %s681_s10, %s677_s9  ;;  %p42_p4 = scmp.eq.s32.totalorder %s734_s13, 0 }
   0xc   : > { %s750_s18 = scalar_select %p26_p1, %s685_s11, %s28_s16  }
   0xd   : > { %p752_p5 = por %p36_p2, %p35_p0  ;;  %p756_p6 = por %p42_p4, %p41_p3 }
   0xe   : > { %p91_p7 = scmp.eq.s32.totalorder %s734_s13, 1  ;;  %p97_p8 = scmp.eq.s32.totalorder %s451_s14, 1 }
   0xf   : > { %s984_s20 = scalar_select %p756_p6, 1, 0 }
  0x10   : > { %p489_p10 = scmp.lt.s32.totalorder %s689_s12, 2  ;;  %p763_p11 = por %p91_p7, %p35_p0 }
  0x11   : > { %p767_p12 = por %p97_p8, %p41_p3  ;;  %s772_s23 = sand.u32 1, %s685_s11  }
  0x12   : > { %s985_s21 = scalar_select %p763_p11, 1, 0 }
  0x13   : > { %s986_s22 = scalar_select %p767_p12, 1, 0 }
  0x14   : > { %s469_s24 = sshll.u32 %s689_s12, 10  ;;  %s454_s25 = sshll.u32 %s772_s23, 6 }
  0x15   : > { %s781_s28 = scalar_lea.hbm %s978_s0, %s469_s24  ;;  %s121_s29 = scalar_lea.vmem [#allocation2], %s454_s25 }
  0x16   : > { %s128_s30 = sshll.u32 %s121_s29, 4  ;;  %p787_p13 = pnand %p489_p10, %p752_p5  ;;  %s791_s30 = int_to_ptr.vmem [resolvable:$true] %s128_s30 }
  0x17   : > { %s118_s4 = scalar_lea.sflag [#allocation3], %s772_s23  ;;  %s559_s5 = scalar_lea.hbm %s781_s28, 1024 }
  0x18   : > { %p560_p0 = scmp.ne.s32.totalorder %s781_s28, %s559_s5  ;;  %p561_p1 = pneg %p787_p13 }
  0x19   : > { %s564_s8 = scalar_lea.hbm %s978_s0, 2048  ;;  %p565_p4 = scmp.lt.u32.totalorder %s781_s28, %s978_s0 }
  0x1a   : > { %p562_p2 = pnand %p561_p1, %p560_p0  ;;  %p566_p5 = scmp.lt.u32.totalorder %s564_s8, %s559_s5 }
  0x1b   : > { %p568_p8 = scmp.lt.u32.totalorder %s559_s5, %s781_s28 }
  0x1c   : > { %p563_p3 = pneg %p562_p2  ;;  %p567_p7 = por %p566_p5, %p565_p4 }
  0x1e   : > { %p569_p10 = por %p568_p8, %p567_p7 }
  0x20   : > { %p570_p9 = pnand %p569_p10, %p563_p3 }
  0x22   : > { %573 = shalt.err (!%p570_p9)
}
  0x23   : > { %s574_s17 = scalar_lea.vmem %s791_s30, 1024  ;;  %s691_s19 = smov [#allocation2]  }
  0x24   : > { %p575_p0 = scmp.ne.s32.totalorder %s791_s30, %s574_s17  ;;  %s579_s26 = sshll.u32 %s691_s19, 4  ;;  %s580_s26 = int_to_ptr.vmem [resolvable:$false] %s579_s26 }
  0x25   : > { %s581_s27 = scalar_lea.vmem %s580_s26, 2048  ;;  %p582_p11 = scmp.lt.s32.totalorder %s791_s30, %s580_s26 }
  0x26   : > { %p577_p2 = pnand %p575_p0, %p561_p1  ;;  %p583_p4 = scmp.lt.s32.totalorder %s581_s27, %s574_s17 }
  0x28   : > { %p578_p12 = pneg %p577_p2  ;;  %p584_p5 = por %p583_p4, %p582_p11 }
  0x2a   : > { %p585_p7 = pnand %p584_p5, %p578_p12 }
  0x2c   : > { %588 = shalt.err (!%p585_p7)
}
  0x2d   : > { %s692_s29 = smov 128   ;;  %s693_s5 = smov 8  }
  0x2e   : > { %481 = dma.hbm_to_vmem [thread:$0]  (!%p787_p13), %s781_s28, 1024, %s791_s30, %s118_s4, %s692_s29, %s692_s29, %s693_s5  }
  0x2f   : > { %p460_p9 = scmp.ge.s32.totalorder %s689_s12, 1  ;;  %p157_p11 = scmp.lt.s32.totalorder %s689_s12, 3 }
  0x30   : > { %s835_s14 = scalar_lea.hbm %s979_s1, %s469_s24  ;;  %s142_s16 = scalar_lea.vmem [#allocation5], %s454_s25 }
  0x31   : > { %p826_p12 = pnand %p460_p9, %p157_p11  ;;  %s149_s17 = sshll.u32 %s142_s16, 4  ;;  %s839_s17 = int_to_ptr.vmem [resolvable:$true] %s149_s17 }
  0x32   : > { %s139_s28 = scalar_lea.sflag [#allocation6], %s772_s23  ;;  %s589_s30 = scalar_lea.hbm %s835_s14, 1024 }
  0x33   : > { %p590_p3 = scmp.ne.s32.totalorder %s835_s14, %s589_s30  ;;  %s594_s24 = scalar_lea.hbm %s979_s1, 2048 }
  0x34   : > { %p595_p0 = scmp.lt.u32.totalorder %s835_s14, %s979_s1  ;;  %p596_p2 = scmp.lt.u32.totalorder %s594_s24, %s589_s30 }
  0x35   : > { %p592_p8 = pnand %p590_p3, %p561_p1  ;;  %p598_p5 = scmp.lt.u32.totalorder %s589_s30, %s835_s14 }
  0x36   : > { %p597_p4 = por %p596_p2, %p595_p0 }
  0x37   : > { %p593_p10 = pneg %p592_p8 }
  0x38   : > { %p599_p7 = por %p598_p5, %p597_p4 }
  0x3a   : > { %p600_p9 = pnand %p599_p7, %p593_p10 }
  0x3c   : > { %603 = shalt.err (!%p600_p9)
}
  0x3d   : > { %s604_s25 = scalar_lea.vmem %s839_s17, 1024  ;;  %s694_s7 = smov [#allocation5]  }
  0x3e   : > { %p605_p11 = scmp.ne.s32.totalorder %s839_s17, %s604_s25  ;;  %s609_s8 = sshll.u32 %s694_s7, 4  ;;  %s610_s8 = int_to_ptr.vmem [resolvable:$false] %s609_s8 }
  0x3f   : > { %s611_s16 = scalar_lea.vmem %s610_s8, 2048  ;;  %p612_p6 = scmp.lt.s32.totalorder %s839_s17, %s610_s8 }
  0x40   : > { %p607_p3 = pnand %p605_p11, %p561_p1  ;;  %p613_p0 = scmp.lt.s32.totalorder %s611_s16, %s604_s25 }
  0x42   : > { %p608_p8 = pneg %p607_p3  ;;  %p614_p2 = por %p613_p0, %p612_p6 }
  0x44   : > { %p615_p4 = pnand %p614_p2, %p608_p8 }
  0x46   : > { %618 = shalt.err (!%p615_p4)
}
  0x47   : > { %484 = dma.hbm_to_vmem [thread:$0]  (!%p787_p13), %s835_s14, 1024, %s839_s17, %s139_s28, %s692_s29, %s692_s29, %s693_s5  }
  0x48   : > { %161 = sbr.rel (%p826_p12) target bundleno = 290 (0x122), region = 28  ;;  %s873_s30 = sand.u32 (!%p826_p12), 1, %s681_s10  }
  0x49   : > { %s876_s4 = sshll.u32 (!%p826_p12), %s873_s30, 6  ;;  %s164_s3 = scalar_lea.sflag (!%p826_p12), [#allocation3], %s873_s30 }
  0x4a   : > { %s167_s19 = scalar_lea.vmem (!%p826_p12), [#allocation2], %s876_s4  ;;  %p989_p6 = scmp.ne.s32.totalorder (!%p826_p12), %s984_s20, 0 }
  0x4f   : > { %664 = dma.done.wait (%p989_p6), %s164_s3, 1024  }
  0x50   : > { %666 = vsyncadd (%p989_p6), %s164_s3, 4294966272  ;;  %s173_s23 = scalar_lea.sflag [#allocation6], %s873_s30  ;;  %s886_s29 = scalar_lea.vmem [#allocation5], %s876_s4 }
  0x51   : > { %668 = dma.done.wait (%p989_p6), %s173_s23, 1024  }
  0x52   : > { %670 = vsyncadd (%p989_p6), %s173_s23, 4294966272  ;;  %v207_v0 = vld [vmem:[%s167_s19 + $0x10] sm:$0xff]  ;;  %v205_v1 = vld [vmem:[%s167_s19] sm:$0xff]  ;;  %s917_s20 = scalar_lea.vmem [#allocation7], %s876_s4  ;;  %s471_s5 = sshll.u32 %s734_s13, 10 }
  0x53   : > { %225 = vmin.xlane.f32.xlu1 %v207_v0  ;;  %221 = vmin.xlane.f32.xlu0 %v205_v1  ;;  %v208_v2 = vld [vmem:[%s167_s19 + $0x18] sm:$0xff]  ;;  %v206_v3 = vld [vmem:[%s167_s19 + $0x8] sm:$0xff]  ;;  %v209_v5 = vld [vmem:[%s167_s19 + $0x20] sm:$0xff]  ;;  %s355_s6 = sshll.u32 %s917_s20, 4  ;;  %s930_s13 = scalar_lea.hbm %s980_s2, %s471_s5  ;;  %s932_s6 = int_to_ptr.vmem [resolvable:$true] %s355_s6 }
  0x54   : > { %v210_v4 = vld [vmem:[%s167_s19 + $0x28] sm:$0xff]  ;;  %v892_v6 = vld [vmem:[%s167_s19 + $0x38] sm:$0xff]  ;;  %v894_v7 = vld [vmem:[%s167_s19 + $0x30] sm:$0xff]  ;;  %s342_s28 = scalar_lea.sflag [#allocation4], %s873_s30  ;;  %s619_s24 = scalar_lea.vmem %s932_s6, 1024 }
  0x55   : > { %v214_v8 = vld [vmem:[%s886_s29 + $0x8] sm:$0xff]  ;;  %v213_v9 = vld [vmem:[%s886_s29] sm:$0xff]  ;;  %v216_v10 = vld [vmem:[%s886_s29 + $0x18] sm:$0xff]  ;;  %p620_p13 = scmp.ne.s32.totalorder %s932_s6, %s619_s24  ;;  %p990_p1 = scmp.ne.s32.totalorder %s985_s21, 0 }
  0x56   : > { %v215_v11 = vld [vmem:[%s886_s29 + $0x10] sm:$0xff]  ;;  %v218_v12 = vld [vmem:[%s886_s29 + $0x28] sm:$0xff]  ;;  %v217_v13 = vld [vmem:[%s886_s29 + $0x20] sm:$0xff]  ;;  %s695_s26 = smov [#allocation7]  }
  0x57   : > { %227 = vmin.xlane.f32.xlu1 %v208_v2  ;;  %223 = vmin.xlane.f32.xlu0 %v206_v3  ;;  %v905_v14 = vld [vmem:[%s886_s29 + $0x38] sm:$0xff]  ;;  %v908_v15 = vld [vmem:[%s886_s29 + $0x30] sm:$0xff]  ;;  %p621_p12 = pnand %p620_p13, %p990_p1  ;;  %s623_s27 = sshll.u32 %s695_s26, 4  ;;  %s624_s27 = int_to_ptr.vmem [resolvable:$false] %s623_s27 }
  0x58   : > { %s625_s25 = scalar_lea.vmem %s624_s27, 2048  ;;  %p626_p5 = scmp.lt.s32.totalorder %s932_s6, %s624_s27 }
  0x59   : > { %p622_p10 = pneg %p621_p12  ;;  %p627_p7 = scmp.lt.s32.totalorder %s625_s25, %s619_s24 }
  0x5b   : > { %231 = vmin.xlane.f32.xlu1 %v210_v4  ;;  %229 = vmin.xlane.f32.xlu0 %v209_v5  ;;  %p628_p9 = por %p627_p7, %p626_p5 }
  0x5d   : > { %p629_p11 = pnand %p628_p9, %p622_p10 }
  0x5f   : > { %235 = vmin.xlane.f32.xlu1 %v892_v6  ;;  %233 = vmin.xlane.f32.xlu0 %v894_v7 }
  0x63   : > { %239 = vmin.xlane.f32.xlu1 %v214_v8  ;;  %237 = vmin.xlane.f32.xlu0 %v213_v9 }
  0x67   : > { %243 = vmin.xlane.f32.xlu1 %v216_v10  ;;  %241 = vmin.xlane.f32.xlu0 %v215_v11 }
  0x6b   : > { %247 = vmin.xlane.f32.xlu1 %v218_v12  ;;  %245 = vmin.xlane.f32.xlu0 %v217_v13 }
  0x6f   : > { %251 = vmin.xlane.f32.xlu1 %v905_v14  ;;  %249 = vmin.xlane.f32.xlu0 %v908_v15 }
  0xe0   : > { %v226_v16 = vpop.xlane.xlu1 %225  ;;  %v222_v17 = vpop.xlane.xlu0 %221 }
  0xe1   : > { %v253_v22 = vsub.f32 %v205_v1, %v222_v17  ;;  %v255_v29 = vsub.f32 %v207_v0, %v226_v16 }
  0xe3   : > { %v261_v27 = vadd.f32 1.0, %v253_v22  ;;  %v263_v38 = vadd.f32 1.0, %v255_v29 }
  0xe4   : > { %v228_v18 = vpop.xlane.xlu1 %227  ;;  %v224_v19 = vpop.xlane.xlu0 %223 }
  0xe5   : > { %v254_v23 = vsub.f32 %v206_v3, %v224_v19  ;;  %v256_v24 = vsub.f32 %v208_v2, %v228_v18  ;;  %527 = vlog2.f32 %v261_v27 }
  0xe7   : > { %v262_v28 = vadd.f32 1.0, %v254_v23  ;;  %v264_v30 = vadd.f32 1.0, %v256_v24 }
  0xe8   : > { %v232_v20 = vpop.xlane.xlu1 %231  ;;  %v230_v21 = vpop.xlane.xlu0 %229 }
  0xe9   : > { %529 = vlog2.f32 %v262_v28  ;;  %v258_v35 = vsub.f32 %v210_v4, %v232_v20  ;;  %v257_v39 = vsub.f32 %v209_v5, %v230_v21 }
  0xea   : > { %531 = vlog2.f32 %v264_v30 }
  0xeb   : > { %v266_v44 = vadd.f32 1.0, %v258_v35  ;;  %v265_v48 = vadd.f32 1.0, %v257_v39 }
  0xec   : > { %v236_v25 = vpop.xlane.xlu1 %235  ;;  %v234_v26 = vpop.xlane.xlu0 %233 }
  0xed   : > { %v260_v45 = vsub.f32 %v892_v6, %v236_v25  ;;  %v259_v49 = vsub.f32 %v894_v7, %v234_v26 }
  0xef   : > { %v268_v54 = vadd.f32 1.0, %v260_v45  ;;  %v528_v57 = vpop.eup %527  ;;  %v267_v58 = vadd.f32 1.0, %v259_v49 }
  0xf0   : > { %v240_v31 = vpop.xlane.xlu1 %239  ;;  %v238_v32 = vpop.xlane.xlu0 %237  ;;  %v270_v7 = vmul.f32 0.6931472, %v528_v57 }
  0xf1   : > { %v286_v33 = vsub.f32 %v214_v8, %v240_v31  ;;  %v285_v34 = vsub.f32 %v213_v9, %v238_v32 }
  0xf3   : > { %v294_v36 = vadd.f32 1.0, %v286_v33  ;;  %v293_v37 = vadd.f32 1.0, %v285_v34  ;;  %v530_v61 = vpop.eup %529 }
  0xf4   : > { %v244_v40 = vpop.xlane.xlu1 %243  ;;  %v242_v41 = vpop.xlane.xlu0 %241  ;;  %v272_v5 = vmul.f32 0.6931472, %v530_v61 }
  0xf5   : > { %533 = vlog2.f32 %v294_v36  ;;  %v288_v42 = vsub.f32 %v216_v10, %v244_v40  ;;  %v287_v43 = vsub.f32 %v215_v11, %v242_v41  ;;  %v532_v0 = vpop.eup %531 }
  0xf6   : > { %535 = vlog2.f32 %v293_v37 }
  0xf7   : > { %v296_v46 = vadd.f32 1.0, %v288_v42  ;;  %v295_v47 = vadd.f32 1.0, %v287_v43  ;;  %537 = vlog2.f32 %v263_v38 }
  0xf8   : > { %v248_v50 = vpop.xlane.xlu1 %247  ;;  %v246_v51 = vpop.xlane.xlu0 %245 }
  0xf9   : > { %539 = vlog2.f32 %v296_v46  ;;  %v290_v52 = vsub.f32 %v218_v12, %v248_v50  ;;  %v289_v53 = vsub.f32 %v217_v13, %v246_v51 }
  0xfa   : > { %541 = vlog2.f32 %v295_v47 }
  0xfb   : > { %543 = vlog2.f32 %v266_v44  ;;  %v298_v55 = vadd.f32 1.0, %v290_v52  ;;  %v297_v56 = vadd.f32 1.0, %v289_v53 }
  0xfc   : > { %545 = vlog2.f32 %v265_v48  ;;  %v252_v59 = vpop.xlane.xlu1 %251  ;;  %v250_v60 = vpop.xlane.xlu0 %249 }
  0xfd   : > { %547 = vlog2.f32 %v298_v55  ;;  %v292_v62 = vsub.f32 %v905_v14, %v252_v59  ;;  %v291_v63 = vsub.f32 %v908_v15, %v250_v60  ;;  %v276_v14 = vmul.f32 0.6931472, %v532_v0 }
  0xfe   : > { %549 = vlog2.f32 %v297_v56 }
  0xff   : > { %v534_v1 = vpop.eup %533  ;;  %551 = vlog2.f32 %v268_v54  ;;  %v300_v2 = vadd.f32 1.0, %v292_v62  ;;  %v299_v3 = vadd.f32 1.0, %v291_v63 }
 0x100   : > { %v536_v4 = vpop.eup %535  ;;  %553 = vlog2.f32 %v267_v58  ;;  %v304_v6 = vmul.f32 0.6931472, %v534_v1 }
 0x101   : > { %v302_v8 = vmul.f32 0.6931472, %v536_v4  ;;  %555 = vlog2.f32 %v300_v2  ;;  %v538_v9 = vpop.eup %537 }
 0x102   : > { %v318_v10 = vsub.f32 %v272_v5, %v304_v6  ;;  %557 = vlog2.f32 %v299_v3  ;;  %v274_v18 = vmul.f32 0.6931472, %v538_v9 }
 0x103   : > { %v540_v11 = vpop.eup %539  ;;  %v317_v12 = vsub.f32 %v270_v7, %v302_v8 }
 0x104   : > { %v542_v13 = vpop.eup %541  ;;  %v326_v15 = vand.u32 2147483647, %v318_v10  ;;  %v308_v16 = vmul.f32 0.6931472, %v540_v11 }
 0x105   : > { %v544_v17 = vpop.eup %543  ;;  %v325_v19 = vand.u32 2147483647, %v317_v12  ;;  %v306_v20 = vmul.f32 0.6931472, %v542_v13 }
 0x106   : > { %v546_v21 = vpop.eup %545  ;;  %334 = vst [vmem:[%s917_s20 + $0x8] sm:$0xff] %v326_v15  ;;  %v320_v22 = vsub.f32 %v276_v14, %v308_v16  ;;  %v280_v26 = vmul.f32 0.6931472, %v544_v17 }
 0x107   : > { %v548_v23 = vpop.eup %547  ;;  %333 = vst [vmem:[%s917_s20] sm:$0xff] %v325_v19  ;;  %v319_v24 = vsub.f32 %v274_v18, %v306_v20  ;;  %v278_v30 = vmul.f32 0.6931472, %v546_v21 }
 0x108   : > { %v550_v25 = vpop.eup %549  ;;  %v328_v27 = vand.u32 2147483647, %v320_v22  ;;  %v312_v28 = vmul.f32 0.6931472, %v548_v23 }
 0x109   : > { %v552_v29 = vpop.eup %551  ;;  %v327_v31 = vand.u32 2147483647, %v319_v24  ;;  %v310_v32 = vmul.f32 0.6931472, %v550_v25 }
 0x10a   : > { %v554_v33 = vpop.eup %553  ;;  %336 = vst [vmem:[%s917_s20 + $0x18] sm:$0xff] %v328_v27  ;;  %v322_v34 = vsub.f32 %v280_v26, %v312_v28  ;;  %v284_v38 = vmul.f32 0.6931472, %v552_v29 }
 0x10b   : > { %v556_v35 = vpop.eup %555  ;;  %335 = vst [vmem:[%s917_s20 + $0x10] sm:$0xff] %v327_v31  ;;  %v321_v36 = vsub.f32 %v278_v30, %v310_v32  ;;  %v282_v41 = vmul.f32 0.6931472, %v554_v33 }
 0x10c   : > { %v558_v37 = vpop.eup %557  ;;  %v330_v39 = vand.u32 2147483647, %v322_v34  ;;  %v316_v40 = vmul.f32 0.6931472, %v556_v35 }
 0x10d   : > { %v329_v42 = vand.u32 2147483647, %v321_v36  ;;  %v314_v43 = vmul.f32 0.6931472, %v558_v37 }
 0x10e   : > { %338 = vst [vmem:[%s917_s20 + $0x28] sm:$0xff] %v330_v39  ;;  %v324_v44 = vsub.f32 %v284_v38, %v316_v40 }
 0x10f   : > { %337 = vst [vmem:[%s917_s20 + $0x20] sm:$0xff] %v329_v42  ;;  %v323_v45 = vsub.f32 %v282_v41, %v314_v43 }
 0x110   : > { %v332_v46 = vand.u32 2147483647, %v324_v44 }
 0x111   : > { %v331_v47 = vand.u32 2147483647, %v323_v45 }
 0x112   : > { %340 = vst [vmem:[%s917_s20 + $0x38] sm:$0xff] %v332_v46 }
 0x113   : > { %339 = vst [vmem:[%s917_s20 + $0x30] sm:$0xff] %v331_v47 }
 0x114   : > { %632 = shalt.err (!%p629_p11)
}
 0x115   : > { %s633_s7 = scalar_lea.hbm %s930_s13, 1024  ;;  %s637_s4 = scalar_lea.hbm %s980_s2, 2048 }
 0x116   : > { %p634_p3 = scmp.ne.s32.totalorder %s930_s13, %s633_s7  ;;  %p638_p2 = scmp.lt.u32.totalorder %s930_s13, %s980_s2 }
 0x117   : > { %p639_p4 = scmp.lt.u32.totalorder %s637_s4, %s633_s7  ;;  %p641_p13 = scmp.lt.u32.totalorder %s633_s7, %s930_s13 }
 0x118   : > { %p635_p8 = pnand %p634_p3, %p990_p1 }
 0x119   : > { %p640_p6 = por %p639_p4, %p638_p2 }
 0x11a   : > { %p636_p0 = pneg %p635_p8 }
 0x11b   : > { %p642_p12 = por %p641_p13, %p640_p6 }
 0x11d   : > { %p643_p10 = pnand %p642_p12, %p636_p0 }
 0x11f   : > { %646 = shalt.err (!%p643_p10)
}
 0x120   : > { %s696_s23 = smov 128   ;;  %s697_s29 = smov 8  }
 0x121   : > { %476 = dma.vmem_to_hbm [thread:$0]  (%p990_p1), %s932_s6, 1024, %s930_s13, %s342_s28, %s696_s23, %s696_s23, %s697_s29  }
 0x122 PF: > { %s370_s20 = sand.u32 1, %s677_s9   ;;  %p991_p5 = scmp.ne.s32.totalorder %s986_s22, 0 }
 0x123   : > { %p992_p7 = scmp.ge.s32.totalorder %s689_s12, 2  ;;  %s371_s5 = scalar_lea.sflag [#allocation4], %s370_s20 }
 0x125   : > { %p486_p9 = pnand %p992_p7, %p991_p5 }
 0x127   : > { %672 = dma.done.wait (!%p486_p9), %s371_s5, 1024  }
 0x128   : > { %674 = vsyncadd (!%p486_p9), %s371_s5, 4294966272  ;;  %p18_p11 = scmp.ge.s32.totalorder %s738_s15, 4   ;;  %s993_s9 = smov %s681_s10 }
 0x129   : > { %s994_s10 = smov %s685_s11  ;;  %s995_s11 = smov %s750_s18 }
 0x12a   : > { %s996_s12 = smov %s738_s15  ;;  %20 = sbr.rel (!%p18_p11) target bundleno = 7 (0x7), region = 86 }
 0x131   :  { %376 = vsyncpa [#allocation3], 1 }
 0x132   :  { %378 = vsyncpa [#allocation3 + $0x1], 1 }
 0x133   :  { %379 = vsyncpa [#allocation6], 1 }
 0x134   :  { %381 = vsyncpa [#allocation6 + $0x1], 1 }
 0x135   :  { %382 = vsyncpa [#allocation4], 1 }
 0x136   :  { %384 = vsyncpa [#allocation4 + $0x1], 1 }

</bundles_post_ra>
